<compile_context>
chip_gen: v7x
topology: tpu7x:2x2x1
jax: 0.10.0
libtpu: 0.0.40
codegen_flags: <defaults>
</compile_context>

<pallas_src>
from functools import lru_cache, partial

import jax
import jax.numpy as jnp
from jax.experimental import pallas as pl
from jax.experimental.pallas import tpu as pltpu


# ----------------------------- Pallas kernels -----------------------------

def _activate_quant_kernel(x_ref, o_ref, *, n_levels: float):
    # clamp(x, 0, 1) followed by uniform quantization to 2**abit levels.
    # Promote to f32 so bf16/fp16 inputs match the torch fp32 math.
    x = x_ref[...].astype(jnp.float32)
    x = jnp.clip(x, 0.0, 1.0)
    # divide (not mul-by-reciprocal) to match torch's round(x*n)/n bit-exactly
    o_ref[...] = (jnp.round(x * n_levels) / n_levels).astype(o_ref.dtype)


def _activate_clamp_kernel(x_ref, o_ref):
    # abit != 32, quantize=False -> just clamp(x, 0, 1)
    o_ref[...] = jnp.clip(x_ref[...], 0.0, 1.0).astype(o_ref.dtype)


def _activate_relu_kernel(x_ref, o_ref):
    # abit == 32 -> plain ReLU (quantizer is identity at 32 bits)
    o_ref[...] = jnp.maximum(x_ref[...], 0.0).astype(o_ref.dtype)


# ------------------------------ helpers ------------------------------------

_LANE = 128
# Below this element count the pallas_call launch / pipeline fill-drain and the
# lost XLA fusion dominate -> just emit the jnp expression.
_PALLAS_MIN_ELEMS = 128 * 1024


@lru_cache(maxsize=1)
def _chip_config():
    """Generation-aware block size / grid policy."""
    kind = ""
    try:
        kind = jax.devices()[0].device_kind.lower()
    except Exception:
        pass
    if "v7" in kind:
        # 2 TensorCores per chip, 64 MiB VMEM (32 MiB scoped default),
        # ~3.2 TB/s HBM per TC -> amortize per-step overhead with ~6 MiB
        # blocks, keep 2*(in+out) double buffers = 24 MiB under a 40 MiB cap,
        # and insist on >= 4 balanced programs so both cores stay busy.
        return {"n_cores": 2,
                "block_bytes": 6 * 1024 * 1024,
                "vmem_limit": 40 * 1024 * 1024}
    # v5e / v6e: one TensorCore, 128 MiB physical VMEM -> bigger blocks and no
    # forced grid split (splitting only shrinks blocks on a single core).
    return {"n_cores": 1,
            "block_bytes": 8 * 1024 * 1024,
            "vmem_limit": 64 * 1024 * 1024}


def _sublane_multiple(dtype):
    # 8 for 4-byte dtypes, 16 for bf16/fp16, 32 for int8/fp8 (packed sublanes).
    return max(8, 32 // jnp.dtype(dtype).itemsize)


def _choose_slab(total):
    """Lane-dense (rows, cols) factorization with NO padding, or None."""
    for cols in (2048, 1024, 512, 256, 128):
        if total % cols == 0:
            return total // cols, cols
    return None


def _choose_tile_rows(rows, cols, itemsize, sub, cfg):
    """Row tile targeting cfg['block_bytes'], rounded to the packed-sublane
    multiple; on multi-TensorCore chips, capped so the parallel grid yields
    >= 2 programs per core."""
    if rows <= 2 * sub:
        return rows                      # single full-extent block (always legal)
    t = cfg["block_bytes"] // (cols * itemsize)
    t = max(sub, (t // sub) * sub)
    if cfg["n_cores"] > 1:
        cap = -(-rows // (2 * cfg["n_cores"]))   # ceil(rows / (2 * n_cores))
        cap = max(sub, -(-cap // sub) * sub)     # round up to sublane multiple
        t = min(t, cap)
    return min(t, rows)


def _activate_math(x, abit, quantize):
    """Plain jnp forward (also the reference)."""
    if abit == 32:
        return jnp.maximum(x, 0.0)
    y = jnp.clip(x, 0.0, 1.0)
    if quantize:
        n = float(2 ** abit - 1)
        y = jnp.round(y * n) / n
    return y


# ------------------------------ Python wrapper -----------------------------

def activate_forward(x, bit_list=(2, 4), quantize=True, *,
                     force_pallas=False, donate=False):
    """JAX/Pallas equivalent of Activate(bit_list, quantize).forward(x)."""
    abit = bit_list[-1]
    orig_shape = x.shape
    dtype = x.dtype
    total = x.size

    slab = _choose_slab(total)
    # Plain-XLA path: tiny tensors (launch overhead + lost fusion dominate) and
    # rare element counts that are not a multiple of 128 (avoids the extra
    # pad + slice HBM passes entirely -- exactly one read + one write).
    if slab is None or not (force_pallas or total >= _PALLAS_MIN_ELEMS):
        return _activate_math(x, abit, quantize)

    rows, cols = slab

    # Pick kernel statically from module config.
    if abit == 32:
        kernel = _activate_relu_kernel
    elif quantize:
        kernel = partial(_activate_quant_kernel, n_levels=float(2 ** abit - 1))
    else:
        kernel = _activate_clamp_kernel

    cfg = _chip_config()
    itemsize = jnp.dtype(dtype).itemsize
    sub = _sublane_multiple(dtype)
    tile_rows = _choose_tile_rows(rows, cols, itemsize, sub, cfg)

    x2d = x.reshape(rows, cols)                  # free: contiguous reshape
    grid = (pl.cdiv(rows, tile_rows),)           # ragged last block handled by Pallas

    out2d = pl.pallas_call(
        kernel,
        out_shape=jax.ShapeDtypeStruct((rows, cols), dtype),
        grid_spec=pltpu.PrefetchScalarGridSpec(
            num_scalar_prefetch=0,
            grid=grid,
            in_specs=[pl.BlockSpec((tile_rows, cols), lambda i: (i, 0))],
            out_specs=pl.BlockSpec((tile_rows, cols), lambda i: (i, 0)),
        ),
        compiler_params=pltpu.CompilerParams(
            dimension_semantics=("parallel",),
            vmem_limit_bytes=cfg["vmem_limit"],
        ),
        input_output_aliases={0: 0} if donate else {},
    )(x2d)

    return out2d.reshape(orig_shape)


# --------------------------------- test -----------------------------------

if __name__ == "__main__":
    key = jax.random.PRNGKey(0)
    k0, k1, k2, k3 = jax.random.split(key, 4)

    # Small NCHW activation (SVHN conv scale); force the Pallas path so the
    # kernel itself is exercised (auto mode would route this tiny tensor to XLA).
    x = jax.random.normal(k0, (2, 4, 16, 16), dtype=jnp.float32) * 2.0

    # Main path: abit = 4, quantized.
    out = jax.block_until_ready(activate_forward(x, (2, 4), True, force_pallas=True))
    ref = _activate_math(x, 4, True)
    assert out.shape == x.shape and out.dtype == x.dtype
    assert jnp.max(jnp.abs(out - ref)) < 1e-6

    # abit == 32 (plain ReLU) path.
    out32 = jax.block_until_ready(activate_forward(x, (32,), True, force_pallas=True))
    assert jnp.max(jnp.abs(out32 - _activate_math(x, 32, True))) < 1e-6

    # Clamp-only path (quantize=False).
    outc = jax.block_until_ready(activate_forward(x, (2,), False, force_pallas=True))
    assert jnp.max(jnp.abs(outc - _activate_math(x, 2, False))) < 1e-6

    # Medium tensor: crosses the auto-Pallas threshold, multi-block parallel
    # grid with a ragged last block on single-TC chips, 4 balanced blocks on v7x.
    xm = jax.random.normal(k1, (10, 16, 128, 128), dtype=jnp.float32) * 2.0
    outm = jax.block_until_ready(activate_forward(xm, (2, 4), True))
    assert jnp.max(jnp.abs(outm - _activate_math(xm, 4, True))) < 1e-6

    # bf16 input: quant math promoted to f32 in-kernel, stored back as bf16.
    xb = (jax.random.normal(k2, (2, 8, 32, 32), dtype=jnp.float32) * 2.0).astype(jnp.bfloat16)
    outb = jax.block_until_ready(activate_forward(xb, (2, 4), True, force_pallas=True))
    refb = _activate_math(xb.astype(jnp.float32), 4, True).astype(jnp.bfloat16)
    assert outb.dtype == jnp.bfloat16
    assert jnp.max(jnp.abs(outb.astype(jnp.float32) - refb.astype(jnp.float32))) < 1e-2

    # Awkward element count (not a multiple of 128): plain-XLA path (no pad,
    # no slice, no extra HBM passes).
    xo = jax.random.normal(k3, (2, 3, 20, 20), dtype=jnp.float32) * 2.0
    outo = jax.block_until_ready(activate_forward(xo, (2, 4), True))
    assert jnp.max(jnp.abs(outo - _activate_math(xo, 4, True))) < 1e-6

    print("KERNEL_OK")
</pallas_src>

<mosaic_0001>
module attributes {stable_mosaic.version = 11 : i64} {
  func.func @_activate_quant_kernel(%arg0: i32, %arg1: memref<1x2048xf32, #tpu.memory_space<vmem>>, %arg2: memref<1x2048xf32, #tpu.memory_space<vmem>>) attributes {dimension_semantics = [#tpu.dimension_semantics<parallel>], iteration_bounds = array<i64: 1>, scalar_prefetch = 0 : i64, scratch_operands = 0 : i64, tpu.core_type = #tpu.core_type<tc>, window_params = [{transform_indices = @transform_0, window_bounds = array<i64: 1, 2048>}, {transform_indices = @transform_1, window_bounds = array<i64: 1, 2048>}]} {
    %c0 = arith.constant 0 : index
    %c0_0 = arith.constant 0 : index
    %0 = vector.load %arg1[%c0, %c0_0] : memref<1x2048xf32, #tpu.memory_space<vmem>>, vector<1x2048xf32>
    %cst = arith.constant 0.000000e+00 : f32
    %cst_1 = arith.constant 1.000000e+00 : f32
    %1 = vector.broadcast %cst : f32 to vector<1x2048xf32>
    %2 = arith.maximumf %1, %0 : vector<1x2048xf32>
    %3 = vector.broadcast %cst_1 : f32 to vector<1x2048xf32>
    %4 = arith.minimumf %3, %2 : vector<1x2048xf32>
    %cst_2 = arith.constant 1.500000e+01 : f32
    %5 = vector.broadcast %cst_2 : f32 to vector<1x2048xf32>
    %6 = arith.mulf %4, %5 : vector<1x2048xf32>
    %7 = math.roundeven %6 : vector<1x2048xf32>
    %cst_3 = arith.constant 1.500000e+01 : f32
    %8 = vector.broadcast %cst_3 : f32 to vector<1x2048xf32>
    %9 = arith.divf %7, %8 : vector<1x2048xf32>
    %c0_4 = arith.constant 0 : index
    %c0_5 = arith.constant 0 : index
    %10 = vector.load %arg2[%c0_4, %c0_5] : memref<1x2048xf32, #tpu.memory_space<vmem>>, vector<1x2048xf32>
    tpu.vector_store %arg2[%c0_4, %c0_5], %9 {strides = array<i32>} : memref<1x2048xf32, #tpu.memory_space<vmem>>, vector<1x2048xf32>,
    return
  }
  func.func @transform_0(%arg0: i32) -> (i32, i32) {
    %c0_i32 = arith.constant 0 : i32
    %c0_i32_0 = arith.constant 0 : i32
    return %arg0, %c0_i32 : i32, i32
  }
  func.func @transform_1(%arg0: i32) -> (i32, i32) {
    %c0_i32 = arith.constant 0 : i32
    %c0_i32_0 = arith.constant 0 : i32
    return %arg0, %c0_i32 : i32, i32
  }
}

</mosaic_0001>

<bundles_post_ra>
// kernel: tpu_custom_call.1
= control target key start
LH: loop header
LB: loop body
LE: loop exit
PB: predicated region body
PF: predicated region fallthrough
CT: control target
= control target key end

     0   :  { %6 = vsyncpa [#allocation3], 0  ;;  %s139_s0 = inlined_call_operand.hbm [shape: f32[1,2048], index: 0, kind: input, shape index: {}]   ;;  %s140_s1 = inlined_call_operand.hbm [shape: f32[1,2048], index: 1, kind: output, shape index: {}]  }
   0x1   :  { %7 = vsyncpa [#allocation4], 0  ;;  %s103_s6 = smov [#allocation2]   ;;  %s55_s10 = scalar_lea.hbm %s139_s0, 256 }
   0x2   :  { %s14_s7 = sshll.u32 %s103_s6, 4  ;;  %p56_p0 = scmp.ne.s32.totalorder %s139_s0, %s55_s10  ;;  %s15_s7 = int_to_ptr.vmem [resolvable:$true] %s14_s7 }
   0x3   :  { %p59_p1 = scmp.lt.u32.totalorder %s55_s10, %s139_s0 }
   0x5   :  { %p61_p2 = pnand %p59_p1, %p56_p0 }
   0x7   :  { %64 = shalt.err (!%p61_p2)
}
   0x8   :  { %s65_s15 = scalar_lea.vmem %s15_s7, 256  ;;  %p70_p4 = scmp.lt.s32.totalorder %s15_s7, %s15_s7 }
   0x9   :  { %p66_p3 = scmp.ne.s32.totalorder %s15_s7, %s65_s15  ;;  %p71_p5 = scmp.lt.s32.totalorder %s65_s15, %s65_s15 }
   0xb   :  { %p72_p6 = por %p71_p5, %p70_p4 }
   0xd   :  { %p73_p7 = pnand %p72_p6, %p66_p3 }
   0xf   :  { %76 = shalt.err (!%p73_p7)
}
  0x10   :  { %17 = dma.hbm_to_vmem [thread:$0]  %s139_s0, 256, %s15_s7, [#allocation3]  }
  0x11   :  { %99 = dma.done.wait [#allocation3], 256  }
  0x12   :  { %100 = vsyncadd [#allocation3], 4294967040  ;;  %v21_v0 = vld [vmem:[#allocation2] sm:$0xff]  ;;  %v22_v1 = vld [vmem:[#allocation2 + $0x8] sm:$0xff]  ;;  %s104_s18 = smov [#allocation5]  }
  0x13   :  { %v23_v2 = vmax.f32 %v21_v0, 0.0  ;;  %v24_v3 = vmax.f32 %v22_v1, 0.0  ;;  %s42_s19 = sshll.u32 %s104_s18, 4  ;;  %s43_s19 = int_to_ptr.vmem [resolvable:$true] %s42_s19 }
  0x14   :  { %s77_s0 = scalar_lea.vmem %s43_s19, 256  ;;  %p82_p9 = scmp.lt.s32.totalorder %s43_s19, %s43_s19 }
  0x15   :  { %v25_v4 = vmin.f32 %v23_v2, 1.0  ;;  %v26_v5 = vmin.f32 %v24_v3, 1.0  ;;  %p78_p8 = scmp.ne.s32.totalorder %s43_s19, %s77_s0  ;;  %p83_p10 = scmp.lt.s32.totalorder %s77_s0, %s77_s0 }
  0x17   :  { %v27_v6 = vmul.f32 15.0, %v25_v4  ;;  %v28_v7 = vmul.f32 15.0, %v26_v5  ;;  %p84_p11 = por %p83_p10, %p82_p9 }
  0x19   :  { %v51_v8 = vround.rtne.f32 %v27_v6  ;;  %v52_v9 = vround.rtne.f32 %v28_v7  ;;  %p85_p12 = pnand %p84_p11, %p78_p8 }
  0x1b   :  { %v32_v10 = vmul.f32 0.06666667, %v51_v8  ;;  %v33_v11 = vmul.f32 0.06666667, %v52_v9 }
  0x1d   :  { %34 = vst [vmem:[#allocation5] sm:$0xff] %v32_v10  ;;  %35 = vst [vmem:[#allocation5 + $0x8] sm:$0xff] %v33_v11 }
  0x1e   :  { %88 = shalt.err (!%p85_p12)
}
  0x1f   :  { %s89_s22 = scalar_lea.hbm %s140_s1, 256 }
  0x20   :  { %p90_p13 = scmp.ne.s32.totalorder %s140_s1, %s89_s22  ;;  %p93_p0 = scmp.lt.u32.totalorder %s89_s22, %s140_s1 }
  0x22   :  { %p95_p1 = pnand %p93_p0, %p90_p13 }
  0x24   :  { %98 = shalt.err (!%p95_p1)
}
  0x25   :  { %45 = dma.vmem_to_hbm [thread:$0]  %s43_s19, 256, %s140_s1, [#allocation4]  }
  0x26   :  { %101 = dma.done.wait [#allocation4], 256  }
  0x27   :  { %102 = vsyncadd [#allocation4], 4294967040 }
  0x28   :  { %49 = vsyncpa [#allocation3], 1 }
  0x29   :  { %50 = vsyncpa [#allocation4], 1 }

</bundles_post_ra>
